<compile_context>
chip_gen: v5e
topology: v5e:2x2
jax: 0.10.0
libtpu: 0.0.40
codegen_flags: <defaults>
</compile_context>

<pallas_src>
import functools

import jax
import jax.numpy as jnp
from jax.experimental import pallas as pl
from jax.experimental.pallas import tpu as pltpu

# Scharr filters, identical to the PyTorch module constants.
_FX = ((-3.0, 0.0, 3.0), (-10.0, 0.0, 10.0), (-3.0, 0.0, 3.0))
_FY = ((-3.0, -10.0, -3.0), (0.0, 0.0, 0.0), (3.0, 10.0, 3.0))
_EPS = 1e-6


def _gradient_loss_kernel(xp_ref, yp_ref, out_ref, *, H, W):
    """xp_ref / yp_ref: (C, H+2, W+2) zero-padded images of one batch element.

    out_ref: (8, 128) lane-dense tile; every element holds this batch
    element's sum(|gradx - grady|) (wrapper reads [0, 0]).
    """
    # conv2d with a channel-replicated filter == conv of the channel sum.
    xs = jnp.sum(xp_ref[...].astype(jnp.float32), axis=0)   # (H+2, W+2)
    ys = jnp.sum(yp_ref[...].astype(jnp.float32), axis=0)

    def grad_mag(img):
        gx = jnp.zeros((H, W), jnp.float32)
        gy = jnp.zeros((H, W), jnp.float32)
        for di in range(3):
            for dj in range(3):
                wx = _FX[di][dj]
                wy = _FY[di][dj]
                if wx == 0.0 and wy == 0.0:
                    continue
                # Cross-correlation tap (matches F.conv2d semantics).
                win = img[di:di + H, dj:dj + W]
                if wx != 0.0:
                    gx = gx + wx * win
                if wy != 0.0:
                    gy = gy + wy * win
        return jnp.sqrt(gx * gx + gy * gy + _EPS)

    d = jnp.abs(grad_mag(xs) - grad_mag(ys))                 # (H, W)
    # Two-stage reduction: cross-lane then cross-sublane -> (1, 1).
    s = jnp.sum(jnp.sum(d, axis=1, keepdims=True), axis=0, keepdims=True)
    # Lane-dense, unmasked store of the per-batch partial sum.
    out_ref[...] = jnp.broadcast_to(s, (8, 128))


def gradient_loss(x, y):
    """x, y: (B, 3, H, W) float arrays. Returns the scalar GradientLoss."""
    assert x.shape == y.shape and x.ndim == 4 and x.shape[1] == 3
    B, C, H, W = x.shape
    Hp, Wp = H + 2, W + 2

    # Zero padding for conv2d(..., padding=1), done once in the wrapper.
    pad = ((0, 0), (0, 0), (1, 1), (1, 1))
    xp = jnp.pad(x, pad)
    yp = jnp.pad(y, pad)

    kernel = functools.partial(_gradient_loss_kernel, H=H, W=W)

    # Whole padded image of one batch element per block (last two dims equal
    # the full array dims, so the (8,128) divisibility rule is satisfied).
    img_spec = pl.BlockSpec((pl.Squeezed(), C, Hp, Wp), lambda b: (b, 0, 0, 0))

    partials = pl.pallas_call(
        kernel,
        out_shape=jax.ShapeDtypeStruct((B, 8, 128), jnp.float32),
        grid_spec=pltpu.PrefetchScalarGridSpec(
            num_scalar_prefetch=0,
            grid=(B,),
            in_specs=[img_spec, img_spec],
            out_specs=pl.BlockSpec((pl.Squeezed(), 8, 128), lambda b: (b, 0, 0)),
        ),
        compiler_params=pltpu.CompilerParams(
            dimension_semantics=("parallel",),       # megacore over batch (v7x)
            vmem_limit_bytes=32 * 1024 * 1024,       # valid on v5e/v6e/v7x
        ),
    )(xp, yp)

    # Final mean: conv output has 1 channel, so numel = B * H * W.
    per_batch = partials[:, 0, 0]                             # (B,)
    return jnp.sum(per_batch) / jnp.float32(B * H * W)


def _reference(x, y):
    """Pure-JAX reference of the PyTorch forward (cross-correlation conv2d)."""
    fx = jnp.asarray(_FX, jnp.float32)
    fy = jnp.asarray(_FY, jnp.float32)

    def conv(img, f):
        w = jnp.broadcast_to(f, (1, 3, 3, 3))
        return jax.lax.conv_general_dilated(
            img, w, window_strides=(1, 1), padding=((1, 1), (1, 1)),
            dimension_numbers=("NCHW", "OIHW", "NCHW"))

    gx = jnp.sqrt(conv(x, fx) ** 2 + conv(x, fy) ** 2 + _EPS)
    gy = jnp.sqrt(conv(y, fx) ** 2 + conv(y, fy) ** 2 + _EPS)
    return jnp.mean(jnp.abs(gx - gy))


if __name__ == "__main__":
    key = jax.random.PRNGKey(0)
    B, C, H, W = 2, 3, 16, 16     # GradientLoss filters require 3 input channels
    k1, k2 = jax.random.split(key)
    x = jax.random.normal(k1, (B, C, H, W), dtype=jnp.float32)
    y = jax.random.normal(k2, (B, C, H, W), dtype=jnp.float32)

    loss = gradient_loss(x, y)
    loss = jax.block_until_ready(loss)

    ref = _reference(x, y)
    assert jnp.allclose(loss, ref, rtol=1e-4, atol=1e-4), (loss, ref)
    print("KERNEL_OK")
</pallas_src>

<mosaic_0001>
module attributes {stable_mosaic.version = 11 : i64} {
  func.func @_gradient_loss_kernel(%arg0: i32, %arg1: memref<1x3x18x18xf32, #tpu.memory_space<vmem>>, %arg2: memref<1x3x18x18xf32, #tpu.memory_space<vmem>>, %arg3: memref<1x8x128xf32, #tpu.memory_space<vmem>>) attributes {dimension_semantics = [#tpu.dimension_semantics<parallel>], iteration_bounds = array<i64: 2>, scalar_prefetch = 0 : i64, scratch_operands = 0 : i64, tpu.core_type = #tpu.core_type<tc>, window_params = [{transform_indices = @transform_0, window_bounds = array<i64: 1, 3, 18, 18>}, {transform_indices = @transform_1, window_bounds = array<i64: 1, 3, 18, 18>}, {transform_indices = @transform_2, window_bounds = array<i64: 1, 8, 128>}]} {
    %c0 = arith.constant 0 : index
    %c0_0 = arith.constant 0 : index
    %c0_1 = arith.constant 0 : index
    %c0_2 = arith.constant 0 : index
    %0 = vector.load %arg1[%c0, %c0_0, %c0_1, %c0_2] : memref<1x3x18x18xf32, #tpu.memory_space<vmem>>, vector<1x3x18x18xf32>
    %1 = vector.shape_cast %0 : vector<1x3x18x18xf32> to vector<3x18x18xf32>
    %cst = arith.constant dense<0.000000e+00> : vector<18x18xf32>
    %2 = vector.multi_reduction <add>, %1, %cst [0] : vector<3x18x18xf32> to vector<18x18xf32>
    %c0_3 = arith.constant 0 : index
    %c0_4 = arith.constant 0 : index
    %c0_5 = arith.constant 0 : index
    %c0_6 = arith.constant 0 : index
    %3 = vector.load %arg2[%c0_3, %c0_4, %c0_5, %c0_6] : memref<1x3x18x18xf32, #tpu.memory_space<vmem>>, vector<1x3x18x18xf32>
    %4 = vector.shape_cast %3 : vector<1x3x18x18xf32> to vector<3x18x18xf32>
    %cst_7 = arith.constant dense<0.000000e+00> : vector<18x18xf32>
    %5 = vector.multi_reduction <add>, %4, %cst_7 [0] : vector<3x18x18xf32> to vector<18x18xf32>
    %cst_8 = arith.constant 0.000000e+00 : f32
    %6 = vector.broadcast %cst_8 : f32 to vector<16x16xf32>
    %cst_9 = arith.constant 0.000000e+00 : f32
    %7 = vector.broadcast %cst_9 : f32 to vector<16x16xf32>
    %8 = vector.extract_strided_slice %2 {offsets = [0, 0], sizes = [16, 16], strides = [1, 1]} : vector<18x18xf32> to vector<16x16xf32>
    %cst_10 = arith.constant -3.000000e+00 : f32
    %9 = vector.broadcast %cst_10 : f32 to vector<16x16xf32>
    %10 = arith.mulf %9, %8 : vector<16x16xf32>
    %11 = arith.addf %6, %10 : vector<16x16xf32>
    %cst_11 = arith.constant -3.000000e+00 : f32
    %12 = vector.broadcast %cst_11 : f32 to vector<16x16xf32>
    %13 = arith.mulf %12, %8 : vector<16x16xf32>
    %14 = arith.addf %7, %13 : vector<16x16xf32>
    %15 = vector.extract_strided_slice %2 {offsets = [0, 1], sizes = [16, 16], strides = [1, 1]} : vector<18x18xf32> to vector<16x16xf32>
    %cst_12 = arith.constant -1.000000e+01 : f32
    %16 = vector.broadcast %cst_12 : f32 to vector<16x16xf32>
    %17 = arith.mulf %16, %15 : vector<16x16xf32>
    %18 = arith.addf %14, %17 : vector<16x16xf32>
    %19 = vector.extract_strided_slice %2 {offsets = [0, 2], sizes = [16, 16], strides = [1, 1]} : vector<18x18xf32> to vector<16x16xf32>
    %cst_13 = arith.constant 3.000000e+00 : f32
    %20 = vector.broadcast %cst_13 : f32 to vector<16x16xf32>
    %21 = arith.mulf %20, %19 : vector<16x16xf32>
    %22 = arith.addf %11, %21 : vector<16x16xf32>
    %cst_14 = arith.constant -3.000000e+00 : f32
    %23 = vector.broadcast %cst_14 : f32 to vector<16x16xf32>
    %24 = arith.mulf %23, %19 : vector<16x16xf32>
    %25 = arith.addf %18, %24 : vector<16x16xf32>
    %26 = vector.extract_strided_slice %2 {offsets = [1, 0], sizes = [16, 16], strides = [1, 1]} : vector<18x18xf32> to vector<16x16xf32>
    %cst_15 = arith.constant -1.000000e+01 : f32
    %27 = vector.broadcast %cst_15 : f32 to vector<16x16xf32>
    %28 = arith.mulf %27, %26 : vector<16x16xf32>
    %29 = arith.addf %22, %28 : vector<16x16xf32>
    %30 = vector.extract_strided_slice %2 {offsets = [1, 2], sizes = [16, 16], strides = [1, 1]} : vector<18x18xf32> to vector<16x16xf32>
    %cst_16 = arith.constant 1.000000e+01 : f32
    %31 = vector.broadcast %cst_16 : f32 to vector<16x16xf32>
    %32 = arith.mulf %31, %30 : vector<16x16xf32>
    %33 = arith.addf %29, %32 : vector<16x16xf32>
    %34 = vector.extract_strided_slice %2 {offsets = [2, 0], sizes = [16, 16], strides = [1, 1]} : vector<18x18xf32> to vector<16x16xf32>
    %cst_17 = arith.constant -3.000000e+00 : f32
    %35 = vector.broadcast %cst_17 : f32 to vector<16x16xf32>
    %36 = arith.mulf %35, %34 : vector<16x16xf32>
    %37 = arith.addf %33, %36 : vector<16x16xf32>
    %cst_18 = arith.constant 3.000000e+00 : f32
    %38 = vector.broadcast %cst_18 : f32 to vector<16x16xf32>
    %39 = arith.mulf %38, %34 : vector<16x16xf32>
    %40 = arith.addf %25, %39 : vector<16x16xf32>
    %41 = vector.extract_strided_slice %2 {offsets = [2, 1], sizes = [16, 16], strides = [1, 1]} : vector<18x18xf32> to vector<16x16xf32>
    %cst_19 = arith.constant 1.000000e+01 : f32
    %42 = vector.broadcast %cst_19 : f32 to vector<16x16xf32>
    %43 = arith.mulf %42, %41 : vector<16x16xf32>
    %44 = arith.addf %40, %43 : vector<16x16xf32>
    %45 = vector.extract_strided_slice %2 {offsets = [2, 2], sizes = [16, 16], strides = [1, 1]} : vector<18x18xf32> to vector<16x16xf32>
    %cst_20 = arith.constant 3.000000e+00 : f32
    %46 = vector.broadcast %cst_20 : f32 to vector<16x16xf32>
    %47 = arith.mulf %46, %45 : vector<16x16xf32>
    %48 = arith.addf %37, %47 : vector<16x16xf32>
    %cst_21 = arith.constant 3.000000e+00 : f32
    %49 = vector.broadcast %cst_21 : f32 to vector<16x16xf32>
    %50 = arith.mulf %49, %45 : vector<16x16xf32>
    %51 = arith.addf %44, %50 : vector<16x16xf32>
    %52 = arith.mulf %48, %48 : vector<16x16xf32>
    %53 = arith.mulf %51, %51 : vector<16x16xf32>
    %54 = arith.addf %52, %53 : vector<16x16xf32>
    %cst_22 = arith.constant 9.99999997E-7 : f32
    %55 = vector.broadcast %cst_22 : f32 to vector<16x16xf32>
    %56 = arith.addf %54, %55 : vector<16x16xf32>
    %57 = math.sqrt %56 : vector<16x16xf32>
    %cst_23 = arith.constant 0.000000e+00 : f32
    %58 = vector.broadcast %cst_23 : f32 to vector<16x16xf32>
    %cst_24 = arith.constant 0.000000e+00 : f32
    %59 = vector.broadcast %cst_24 : f32 to vector<16x16xf32>
    %60 = vector.extract_strided_slice %5 {offsets = [0, 0], sizes = [16, 16], strides = [1, 1]} : vector<18x18xf32> to vector<16x16xf32>
    %cst_25 = arith.constant -3.000000e+00 : f32
    %61 = vector.broadcast %cst_25 : f32 to vector<16x16xf32>
    %62 = arith.mulf %61, %60 : vector<16x16xf32>
    %63 = arith.addf %58, %62 : vector<16x16xf32>
    %cst_26 = arith.constant -3.000000e+00 : f32
    %64 = vector.broadcast %cst_26 : f32 to vector<16x16xf32>
    %65 = arith.mulf %64, %60 : vector<16x16xf32>
    %66 = arith.addf %59, %65 : vector<16x16xf32>
    %67 = vector.extract_strided_slice %5 {offsets = [0, 1], sizes = [16, 16], strides = [1, 1]} : vector<18x18xf32> to vector<16x16xf32>
    %cst_27 = arith.constant -1.000000e+01 : f32
    %68 = vector.broadcast %cst_27 : f32 to vector<16x16xf32>
    %69 = arith.mulf %68, %67 : vector<16x16xf32>
    %70 = arith.addf %66, %69 : vector<16x16xf32>
    %71 = vector.extract_strided_slice %5 {offsets = [0, 2], sizes = [16, 16], strides = [1, 1]} : vector<18x18xf32> to vector<16x16xf32>
    %cst_28 = arith.constant 3.000000e+00 : f32
    %72 = vector.broadcast %cst_28 : f32 to vector<16x16xf32>
    %73 = arith.mulf %72, %71 : vector<16x16xf32>
    %74 = arith.addf %63, %73 : vector<16x16xf32>
    %cst_29 = arith.constant -3.000000e+00 : f32
    %75 = vector.broadcast %cst_29 : f32 to vector<16x16xf32>
    %76 = arith.mulf %75, %71 : vector<16x16xf32>
    %77 = arith.addf %70, %76 : vector<16x16xf32>
    %78 = vector.extract_strided_slice %5 {offsets = [1, 0], sizes = [16, 16], strides = [1, 1]} : vector<18x18xf32> to vector<16x16xf32>
    %cst_30 = arith.constant -1.000000e+01 : f32
    %79 = vector.broadcast %cst_30 : f32 to vector<16x16xf32>
    %80 = arith.mulf %79, %78 : vector<16x16xf32>
    %81 = arith.addf %74, %80 : vector<16x16xf32>
    %82 = vector.extract_strided_slice %5 {offsets = [1, 2], sizes = [16, 16], strides = [1, 1]} : vector<18x18xf32> to vector<16x16xf32>
    %cst_31 = arith.constant 1.000000e+01 : f32
    %83 = vector.broadcast %cst_31 : f32 to vector<16x16xf32>
    %84 = arith.mulf %83, %82 : vector<16x16xf32>
    %85 = arith.addf %81, %84 : vector<16x16xf32>
    %86 = vector.extract_strided_slice %5 {offsets = [2, 0], sizes = [16, 16], strides = [1, 1]} : vector<18x18xf32> to vector<16x16xf32>
    %cst_32 = arith.constant -3.000000e+00 : f32
    %87 = vector.broadcast %cst_32 : f32 to vector<16x16xf32>
    %88 = arith.mulf %87, %86 : vector<16x16xf32>
    %89 = arith.addf %85, %88 : vector<16x16xf32>
    %cst_33 = arith.constant 3.000000e+00 : f32
    %90 = vector.broadcast %cst_33 : f32 to vector<16x16xf32>
    %91 = arith.mulf %90, %86 : vector<16x16xf32>
    %92 = arith.addf %77, %91 : vector<16x16xf32>
    %93 = vector.extract_strided_slice %5 {offsets = [2, 1], sizes = [16, 16], strides = [1, 1]} : vector<18x18xf32> to vector<16x16xf32>
    %cst_34 = arith.constant 1.000000e+01 : f32
    %94 = vector.broadcast %cst_34 : f32 to vector<16x16xf32>
    %95 = arith.mulf %94, %93 : vector<16x16xf32>
    %96 = arith.addf %92, %95 : vector<16x16xf32>
    %97 = vector.extract_strided_slice %5 {offsets = [2, 2], sizes = [16, 16], strides = [1, 1]} : vector<18x18xf32> to vector<16x16xf32>
    %cst_35 = arith.constant 3.000000e+00 : f32
    %98 = vector.broadcast %cst_35 : f32 to vector<16x16xf32>
    %99 = arith.mulf %98, %97 : vector<16x16xf32>
    %100 = arith.addf %89, %99 : vector<16x16xf32>
    %cst_36 = arith.constant 3.000000e+00 : f32
    %101 = vector.broadcast %cst_36 : f32 to vector<16x16xf32>
    %102 = arith.mulf %101, %97 : vector<16x16xf32>
    %103 = arith.addf %96, %102 : vector<16x16xf32>
    %104 = arith.mulf %100, %100 : vector<16x16xf32>
    %105 = arith.mulf %103, %103 : vector<16x16xf32>
    %106 = arith.addf %104, %105 : vector<16x16xf32>
    %cst_37 = arith.constant 9.99999997E-7 : f32
    %107 = vector.broadcast %cst_37 : f32 to vector<16x16xf32>
    %108 = arith.addf %106, %107 : vector<16x16xf32>
    %109 = math.sqrt %108 : vector<16x16xf32>
    %110 = arith.subf %57, %109 : vector<16x16xf32>
    %111 = math.absf %110 : vector<16x16xf32>
    %cst_38 = arith.constant dense<0.000000e+00> : vector<16xf32>
    %112 = vector.multi_reduction <add>, %111, %cst_38 [1] : vector<16x16xf32> to vector<16xf32>
    %113 = vector.shape_cast %112 : vector<16xf32> to vector<16x1xf32>
    %cst_39 = arith.constant dense<0.000000e+00> : vector<1xf32>
    %114 = vector.multi_reduction <add>, %113, %cst_39 [0] : vector<16x1xf32> to vector<1xf32>
    %115 = vector.shape_cast %114 : vector<1xf32> to vector<1x1xf32>
    %116 = vector.shape_cast %115 : vector<1x1xf32> to vector<1x1xf32>
    %117 = vector.broadcast %116 : vector<1x1xf32> to vector<8x128xf32>
    %c0_40 = arith.constant 0 : index
    %c0_41 = arith.constant 0 : index
    %c0_42 = arith.constant 0 : index
    %118 = vector.load %arg3[%c0_40, %c0_41, %c0_42] : memref<1x8x128xf32, #tpu.memory_space<vmem>>, vector<1x8x128xf32>
    %119 = vector.shape_cast %118 : vector<1x8x128xf32> to vector<8x128xf32>
    %120 = vector.shape_cast %117 : vector<8x128xf32> to vector<1x8x128xf32>
    tpu.vector_store %arg3[%c0_40, %c0_41, %c0_42], %120 {strides = array<i32>} : memref<1x8x128xf32, #tpu.memory_space<vmem>>, vector<1x8x128xf32>,
    return
  }
  func.func @transform_0(%arg0: i32) -> (i32, i32, i32, i32) {
    %c0_i32 = arith.constant 0 : i32
    %c0_i32_0 = arith.constant 0 : i32
    %c0_i32_1 = arith.constant 0 : i32
    %c0_i32_2 = arith.constant 0 : i32
    return %arg0, %c0_i32, %c0_i32_0, %c0_i32_1 : i32, i32, i32, i32
  }
  func.func @transform_1(%arg0: i32) -> (i32, i32, i32, i32) {
    %c0_i32 = arith.constant 0 : i32
    %c0_i32_0 = arith.constant 0 : i32
    %c0_i32_1 = arith.constant 0 : i32
    %c0_i32_2 = arith.constant 0 : i32
    return %arg0, %c0_i32, %c0_i32_0, %c0_i32_1 : i32, i32, i32, i32
  }
  func.func @transform_2(%arg0: i32) -> (i32, i32, i32) {
    %c0_i32 = arith.constant 0 : i32
    %c0_i32_0 = arith.constant 0 : i32
    %c0_i32_1 = arith.constant 0 : i32
    return %arg0, %c0_i32, %c0_i32_0 : i32, i32, i32
  }
}

</mosaic_0001>

<bundles_post_ra>
// kernel: tpu_custom_call.1
= control target key start
LH: loop header
LB: loop body
LE: loop exit
PB: predicated region body
PF: predicated region fallthrough
CT: control target
= control target key end

     0   :  { %7 = vsyncpa [#allocation3], 0  ;;  %s1029_s0 = inlined_call_operand.vmem [shape: f32[2,3,18,18], index: 0, kind: input, shape index: {}]   ;;  %s1030_s1 = inlined_call_operand.vmem [shape: f32[2,3,18,18], index: 1, kind: input, shape index: {}]   ;;  %s1031_s2 = inlined_call_operand.hbm [shape: f32[2,8,128], index: 2, kind: output, shape index: {}]  }
   0x1   :  { %9 = vsyncpa [#allocation3 + $0x1], 0  ;;  %s752_s9 = smov 0   ;;  %s754_s10 = smov 0  }
   0x2   :  { %s756_s11 = smov 0   ;;  %s758_s12 = smov 0  }
   0x3 LB: > { %s773_s13 = sadd.s32 4294967295, %s733_s12   ;;  %s610_s14 = sadd.s32 4294967294, %s733_s12   ;;  %s733_s12 = sphi %s758_s12, %s1037_s12   ;;  %s729_s11 = sphi %s756_s11, %s1036_s11   ;;  %s725_s10 = sphi %s754_s10, %s1035_s10   ;;  %s721_s9 = sphi %s752_s9, %s1034_s9  }
   0x4   : > { %s777_s15 = sadd.s32 1, %s733_s12   ;;  %s74_s16 = sadd.s32 1, %s729_s11 }
   0x5   : > { %s71_s17 = ssub.s32 %s733_s12, %s777_s15  ;;  %p84_p0 = scmp.ne.s32.totalorder %s729_s11, %s725_s10 }
   0x6   : > { %p72_p1 = scmp.eq.s32.totalorder %s71_s17, 0  ;;  %p85_p2 = scmp.eq.s32.totalorder %s773_s13, 1 }
   0x7   : > { %p90_p3 = scmp.ne.s32.totalorder %s725_s10, %s721_s9  ;;  %p91_p4 = scmp.eq.s32.totalorder %s610_s14, 1 }
   0x8   : > { %s788_s18 = scalar_select %p72_p1, %s729_s11, %s74_s16  }
   0x9   : > { %p790_p5 = por %p85_p2, %p84_p0  ;;  %p794_p6 = por %p91_p4, %p90_p3 }
   0xa   : > { %p613_p7 = scmp.ge.s32.totalorder %s733_s12, 1  ;;  %p125_p8 = scmp.lt.s32.totalorder %s733_s12, 3 }
   0xc   : > { %p126_p9 = pnand %p613_p7, %p125_p8 }
   0xd   : > { %p152_p10 = scmp.lt.s32.totalorder (!%p126_p9), %s773_s13, 1  ;;  %s735_s29 = smov (!%p126_p9), 126  }
   0xe   : > { %129 = sbr.rel (%p126_p9) target bundleno = 371 (0x173), region = 28  ;;  %s736_s30 = smov (!%p126_p9), 127  }
   0xf   : > { %s149_s3 = sand.u32 (!%p126_p9), 1, %s725_s10   ;;  %s618_s5 = sshll.u32 (!%p126_p9), %s773_s13, 3 }
  0x10   : > { %s614_s4 = sshll.u32 (!%p126_p9), %s149_s3, 3  ;;  %s534_s8 = scalar_lea.hbm (!%p126_p9), %s1031_s2, %s618_s5 }
  0x11   : > { %s151_s14 = scalar_lea.vmem (!%p126_p9), [#allocation2], %s614_s4  ;;  %s538_s17 = sshll.u32 (!%p126_p9), %s534_s8, 4  ;;  %s539_s17 = int_to_ptr.hbm [resolvable:$true] %s538_s17 }
  0x12   : > { %s536_s16 = sshll.u32 (!%p126_p9), %s151_s14, 4  ;;  %s537_s16 = int_to_ptr.vmem [resolvable:$true] %s536_s16 }
  0x13   : > { %s153_s21 = scalar_select %p152_p10, %s773_s13, 1  ;;  %vm171_vm0 = vcmask 146432   ;;  %vm182_vm1 = vcmask 140288   ;;  %vm252_vm2 = vcmask 1046528   ;;  %vm283_vm3 = vcmask 1045504  }
  0x14   : > { %vm508_vm12 = vcmask 130048  }
  0x15   : > { %s621_s22 = smul.u32 72, %s153_s21  ;;  %s524_s21 = scalar_lea.sflag [#allocation3], %s149_s3 }
  0x17   : > { %s805_s25 = scalar_lea.vmem %s1029_s0, %s621_s22  ;;  %s810_s28 = scalar_lea.vmem %s1030_s1, %s621_s22 }
  0x18   : > { %v162_v0 = vld [vmem:[%s805_s25] sm:$0xff]  ;;  %v165_v1 = vld [vmem:[%s805_s25 + $0x18] sm:$0xff]  ;;  %v168_v2 = vld [vmem:[%s805_s25 + $0x30] sm:$0xff]  ;;  %s685_s22 = sshra.s32 %s539_s17, 4  ;;  %s686_s22 = int_to_ptr.hbm [resolvable:$true] %s685_s22 }
  0x19   : > { %v172_v3 = vsel %vm171_vm0, %v162_v0, 0.0  ;;  %v173_v4 = vsel %vm171_vm0, %v165_v1, 0.0  ;;  %v175_v5 = vsel %vm171_vm0, %v168_v2, 0.0  ;;  %v163_v6 = vld [vmem:[%s805_s25 + $0x8] sm:$0xff]  ;;  %v166_v7 = vld [vmem:[%s805_s25 + $0x20] sm:$0xff]  ;;  %v169_v8 = vld [vmem:[%s805_s25 + $0x38] sm:$0xff]  ;;  %p692_p0 = scmp.lt.s32.totalorder %s686_s22, %s1031_s2 }
  0x1a   : > { %v174_v9 = vadd.f32 %v173_v4, %v172_v3  ;;  %v177_v10 = vsel %vm171_vm0, %v163_v6, 0.0  ;;  %v178_v11 = vsel %vm171_vm0, %v166_v7, 0.0  ;;  %v188_v12 = vld [vmem:[%s810_s28] sm:$0xff]  ;;  %v191_v13 = vld [vmem:[%s810_s28 + $0x18] sm:$0xff]  ;;  %v194_v14 = vld [vmem:[%s810_s28 + $0x30] sm:$0xff]  ;;  %v180_v23 = vsel %vm171_vm0, %v169_v8, 0.0 }
  0x1b   : > { %v197_v15 = vsel %vm171_vm0, %v188_v12, 0.0  ;;  %v198_v16 = vsel %vm171_vm0, %v191_v13, 0.0  ;;  %v200_v17 = vsel %vm171_vm0, %v194_v14, 0.0  ;;  %v189_v18 = vld [vmem:[%s810_s28 + $0x8] sm:$0xff]  ;;  %v192_v19 = vld [vmem:[%s810_s28 + $0x20] sm:$0xff]  ;;  %v179_v21 = vadd.f32 %v178_v11, %v177_v10  ;;  %v195_v29 = vld [vmem:[%s810_s28 + $0x38] sm:$0xff] }
  0x1c   : > { %v176_v20 = vadd.f32 %v175_v5, %v174_v9  ;;  %v199_v22 = vadd.f32 %v198_v16, %v197_v15  ;;  %v202_v24 = vsel %vm171_vm0, %v189_v18, 0.0  ;;  %v203_v25 = vsel %vm171_vm0, %v192_v19, 0.0  ;;  %v164_v38 = vld [vmem:[%s805_s25 + $0x10] sm:$0x3]  ;;  %v167_v39 = vld [vmem:[%s805_s25 + $0x28] sm:$0x3] }
  0x1d   : > { %v181_v30 = vadd.f32 %v180_v23, %v179_v21  ;;  %v204_v32 = vadd.f32 %v203_v25, %v202_v24  ;;  %v205_v33 = vsel %vm171_vm0, %v195_v29, 0.0  ;;  %v183_v40 = vsel %vm182_vm1, %v164_v38, 0.0  ;;  %v170_v42 = vld [vmem:[%s805_s25 + $0x40] sm:$0x3]  ;;  %v190_v48 = vld [vmem:[%s810_s28 + $0x10] sm:$0x3] }
  0x1e   : > { %v834_v26 = vmul.f32 3.0, %v176_v20  ;;  %v836_v27 = vmul.f32 -10.0, %v176_v20  ;;  %v201_v28 = vadd.f32 %v200_v17, %v199_v22  ;;  %v184_v41 = vsel %vm182_vm1, %v167_v39, 0.0  ;;  %v193_v49 = vld [vmem:[%s810_s28 + $0x28] sm:$0x3]  ;;  %s687_s13 = scalar_lea.hbm %s686_s22, 8 }
  0x1f   : > { %v848_v34 = vmul.f32 3.0, %v181_v30  ;;  %v850_v35 = vmul.f32 -10.0, %v181_v30  ;;  %v206_v36 = vadd.f32 %v205_v33, %v204_v32  ;;  %v185_v45 = vadd.f32 %v184_v41, %v183_v40  ;;  %v196_v53 = vld [vmem:[%s810_s28 + $0x40] sm:$0x3]  ;;  %p688_p11 = scmp.ne.s32.totalorder %s686_s22, %s687_s13  ;;  %s691_s25 = scalar_lea.hbm %s1031_s2, 16 }
  0x20   : > { %232 = vrot.lane.b32.xlu1 %v834_v26, %s735_s29  ;;  %220 = vrot.lane.b32.xlu0 %v836_v27, %s736_s30  ;;  %v843_v31 = vmul.f32 -10.0, %v201_v28  ;;  %v867_v44 = vmul.f32 3.0, %v201_v28  ;;  %v869_v46 = vmul.f32 -3.0, %v176_v20  ;;  %v186_v47 = vsel %vm182_vm1, %v170_v42, 0.0  ;;  %p693_p1 = scmp.lt.s32.totalorder %s691_s25, %s687_s13 }
  0x21   : > { %v852_v37 = vmul.f32 -10.0, %v206_v36  ;;  %v865_v43 = vmul.f32 3.0, %v206_v36  ;;  %v878_v50 = vadd.f32 %v186_v47, %v185_v45  ;;  %v207_v51 = vsel %vm182_vm1, %v190_v48, 0.0  ;;  %p689_p12 = pnand %p688_p11, %p790_p5 }
  0x22   : > { %367 = vrot.lane.b32.xlu2 %v843_v31, %s736_s30  ;;  %v208_v52 = vsel %vm182_vm1, %v193_v49, 0.0  ;;  %v885_v54 = vmul.f32 -3.0, %v201_v28  ;;  %v887_v55 = vmul.f32 -3.0, %v181_v30  ;;  %v263_v56 = vmul.f32 10.0, %v181_v30  ;;  %p694_p2 = por %p693_p1, %p692_p0 }
  0x23   : > { %v264_v57 = vmul.f32 10.0, %v878_v50  ;;  %v262_v58 = vmul.f32 10.0, %v176_v20  ;;  %v209_v59 = vadd.f32 %v208_v52, %v207_v51  ;;  %v890_v60 = vmul.f32 -3.0, %v206_v36  ;;  %p690_p13 = pneg %p689_p12 }
  0x24   : > { %v210_v61 = vsel %vm182_vm1, %v196_v53, 0.0  ;;  %v408_v62 = vmul.f32 10.0, %v201_v28  ;;  %v269_v63 = vrot.slane %v263_v56, 1  ;;  %v409_v3 = vmul.f32 10.0, %v206_v36 }
  0x25   : > { %v271_v0 = vrot.slane %v264_v57, 1  ;;  %v268_v1 = vrot.slane %v262_v58, 1  ;;  %v897_v2 = vadd.f32 %v210_v61, %v209_v59  ;;  %v304_v10 = vrot.slane %v262_v58, 2  ;;  %p695_p3 = pnand %p694_p2, %p690_p13 }
  0x26   : > { %v414_v4 = vrot.slane %v408_v62, 1  ;;  %v415_v8 = vrot.slane %v409_v3, 1  ;;  %v305_v11 = vrot.slane %v263_v56, 2  ;;  %v307_v13 = vrot.slane %v264_v57, 2 }
  0x27   : > { %v272_v5 = vsel %vm252_vm2, %v269_v63, %v271_v0  ;;  %v270_v6 = vsel %vm252_vm2, %v268_v1, %v269_v63  ;;  %v410_v7 = vmul.f32 10.0, %v897_v2  ;;  %v450_v17 = vrot.slane %v409_v3, 2 }
  0x28   : > { %234 = vrot.lane.b32.xlu1 %v848_v34, %s735_s29  ;;  %222 = vrot.lane.b32.xlu0 %v850_v35, %s736_s30  ;;  %v416_v9 = vsel %vm252_vm2, %v414_v4, %v415_v8  ;;  %v306_v14 = vsel %vm283_vm3, %v304_v10, %v305_v11  ;;  %v308_v16 = vsel %vm283_vm3, %v305_v11, %v307_v13  ;;  %v449_v19 = vrot.slane %v408_v62, 2 }
  0x29   : > { %v417_v12 = vrot.slane %v410_v7, 1  ;;  %v452_v18 = vrot.slane %v410_v7, 2  ;;  %v295_v20 = vrot.slane %v834_v26, 2  ;;  %v296_v21 = vrot.slane %v848_v34, 2 }
  0x2a   : > { %369 = vrot.lane.b32.xlu2 %v852_v37, %s736_s30  ;;  %v451_v23 = vsel %vm283_vm3, %v449_v19, %v450_v17  ;;  %v293_v24 = vmul.f32 3.0, %v878_v50  ;;  %v438_v28 = vmul.f32 3.0, %v897_v2  ;;  %v441_v29 = vrot.slane %v865_v43, 2 }
  0x2b   : > { %v418_v15 = vsel %vm252_vm2, %v415_v8, %v417_v12  ;;  %v453_v22 = vsel %vm283_vm3, %v450_v17, %v452_v18  ;;  %v297_v25 = vsel %vm283_vm3, %v295_v20, %v296_v21  ;;  %v440_v26 = vrot.slane %v867_v44, 2 }
  0x2c   : > { %v298_v30 = vrot.slane %v293_v24, 2  ;;  %v443_v32 = vrot.slane %v438_v28, 2  ;;  %v253_v38 = vrot.slane %v836_v27, 1  ;;  %v254_v39 = vrot.slane %v850_v35, 1 }
  0x2d   : > { %v927_v33 = vsel %vm283_vm3, %v440_v26, %v441_v29  ;;  %v399_v42 = vrot.slane %v843_v31, 1  ;;  %v285_v61 = vrot.slane %v887_v55, 2  ;;  %v284_v62 = vrot.slane %v869_v46, 2 }
  0x2e   : > { %v930_v34 = vsel %vm283_vm3, %v296_v21, %v298_v30  ;;  %v933_v36 = vsel %vm283_vm3, %v441_v29, %v443_v32  ;;  %v255_v40 = vsel %vm252_vm2, %v253_v38, %v254_v39  ;;  %v427_v7 = vmul.f32 -3.0, %v897_v2 }
  0x2f   : > { %v250_v12 = vmul.f32 -10.0, %v878_v50  ;;  %v430_v17 = vrot.slane %v890_v60, 2  ;;  %v281_v30 = vmul.f32 -3.0, %v878_v50 }
  0x30   : > { %381 = vrot.lane.b32.xlu1 %v865_v43, %s735_s29  ;;  %379 = vrot.lane.b32.xlu0 %v867_v44, %s735_s29  ;;  %v400_v43 = vrot.slane %v852_v37, 1  ;;  %v397_v37 = vmul.f32 -10.0, %v897_v2 }
  0x31   : > { %v256_v20 = vrot.slane %v250_v12, 1 }
  0x32   : > { %242 = vrot.lane.b32.xlu2 %v869_v46, %s735_s29  ;;  %v401_v44 = vsel %vm252_vm2, %v399_v42, %v400_v43  ;;  %v402_v4 = vrot.slane %v397_v37, 1 }
  0x34   : > { %v403_v11 = vsel %vm252_vm2, %v400_v43, %v402_v4 }
  0x38   : > { %389 = vrot.lane.b32.xlu1 %v885_v54, %s735_s29  ;;  %244 = vrot.lane.b32.xlu0 %v887_v55, %s735_s29 }
  0x3a   : > { %391 = vrot.lane.b32.xlu2 %v890_v60, %s735_s29 }
  0x40   : > { %275 = vrot.lane.b32.xlu1 %v272_v5, %s735_s29  ;;  %273 = vrot.lane.b32.xlu0 %v270_v6, %s735_s29  ;;  %v286_v6 = vsel %vm283_vm3, %v284_v62, %v285_v61 }
  0x42   : > { %419 = vrot.lane.b32.xlu2 %v416_v9, %s735_s29 }
  0x48   : > { %309 = vrot.lane.b32.xlu1 %v306_v14, %s736_s30  ;;  %421 = vrot.lane.b32.xlu0 %v418_v15, %s735_s29  ;;  %v432_v14 = vrot.slane %v427_v7, 2 }
  0x4a   : > { %311 = vrot.lane.b32.xlu2 %v308_v16, %s736_s30 }
  0x50   : > { %456 = vrot.lane.b32.xlu1 %v453_v22, %s736_s30  ;;  %454 = vrot.lane.b32.xlu0 %v451_v23, %s736_s30  ;;  %v433_v23 = vsel %vm283_vm3, %v430_v17, %v432_v14 }
  0x52   : > { %317 = vrot.lane.b32.xlu2 %v297_v25, %s735_s29 }
  0x58   : > { %462 = vrot.lane.b32.xlu1 %v927_v33, %s735_s29  ;;  %319 = vrot.lane.b32.xlu0 %v930_v34, %s735_s29 }
  0x5a   : > { %464 = vrot.lane.b32.xlu2 %v933_v36, %s735_s29 }
  0x7c   : > { %v368_v41 = vpop.permute.xlu2 %367 }
  0x7d   : > { %v373_v43 = vadd.f32 %v368_v41, %v885_v54 }
  0x84   : > { %v370_v45 = vpop.permute.xlu2 %369 }
  0x8c   : > { %v243_v47 = vpop.permute.xlu2 %242 }
  0x92   : > { %v233_v48 = vpop.permute.xlu1 %232  ;;  %v221_v49 = vpop.permute.xlu0 %220 }
  0x93   : > { %v238_v31 = vadd.f32 %v233_v48, %v869_v46  ;;  %v226_v63 = vadd.f32 %v221_v49, %v869_v46  ;;  %v374_v46 = vadd.f32 %v370_v45, %v890_v60  ;;  %v429_v49 = vrot.slane %v885_v54, 2 }
  0x94   : > { %v392_v51 = vpop.permute.xlu2 %391 }
  0x95   : > { %v260_v0 = vadd.f32 %v255_v40, %v238_v31  ;;  %v248_v8 = vadd.f32 %v243_v47, %v226_v63  ;;  %v396_v24 = vadd.f32 %v392_v51, %v374_v46  ;;  %v431_v41 = vsel %vm283_vm3, %v429_v49, %v430_v17 }
  0x97   : > { %v302_v15 = vadd.f32 %v297_v25, %v248_v8  ;;  %v257_v25 = vsel %vm252_vm2, %v254_v39, %v256_v20  ;;  %v448_v48 = vadd.f32 %v933_v36, %v396_v24 }
  0x9a   : > { %v235_v52 = vpop.permute.xlu1 %234  ;;  %v223_v53 = vpop.permute.xlu0 %222 }
  0x9b   : > { %v239_v26 = vadd.f32 %v235_v52, %v887_v55  ;;  %v227_v40 = vadd.f32 %v223_v53, %v887_v55 }
  0x9c   : > { %v420_v56 = vpop.permute.xlu2 %419 }
  0x9d   : > { %v261_v52 = vadd.f32 %v257_v25, %v239_v26 }
  0xa2   : > { %v382_v27 = vpop.permute.xlu1 %381  ;;  %v380_v57 = vpop.permute.xlu0 %379 }
  0xa3   : > { %v386_v9 = vadd.f32 %v382_v27, %v890_v60  ;;  %v385_v28 = vadd.f32 %v380_v57, %v885_v54  ;;  %v287_v27 = vrot.slane %v281_v30, 2 }
  0xa4   : > { %v947_v59 = vpop.permute.xlu2 %311 }
  0xa5   : > { %v407_v16 = vadd.f32 %v403_v11, %v386_v9  ;;  %v406_v45 = vadd.f32 %v401_v44, %v385_v28  ;;  %v288_v54 = vsel %vm283_vm3, %v285_v61, %v287_v27 }
  0xa7   : > { %v425_v55 = vadd.f32 %v420_v56, %v406_v45 }
  0xaa   : > { %v390_v35 = vpop.permute.xlu1 %389  ;;  %v245_v58 = vpop.permute.xlu0 %244 }
  0xab   : > { %v249_v51 = vadd.f32 %v245_v58, %v227_v40  ;;  %v395_v39 = vadd.f32 %v390_v35, %v373_v43  ;;  %v436_v35 = vadd.f32 %v431_v41, %v425_v55 }
  0xac   : > { %v318_v10 = vpop.permute.xlu2 %317 }
  0xad   : > { %v303_v36 = vadd.f32 %v930_v34, %v249_v51 }
  0xaf   : > { %v316_v56 = vadd.f32 %v947_v59, %v303_v36 }
  0xb2   : > { %v276_v1 = vpop.permute.xlu1 %275  ;;  %v274_v3 = vpop.permute.xlu0 %273 }
  0xb3   : > { %v279_v5 = vadd.f32 %v274_v3, %v260_v0  ;;  %v280_v53 = vadd.f32 %v276_v1, %v261_v52  ;;  %v447_v0 = vadd.f32 %v927_v33, %v395_v39 }
  0xb4   : > { %v465_v42 = vpop.permute.xlu2 %464 }
  0xb5   : > { %v291_v13 = vadd.f32 %v286_v6, %v279_v5  ;;  %v292_v3 = vadd.f32 %v288_v54, %v280_v53 }
  0xb7   : > { %v323_v2 = vadd.f32 %v318_v10, %v291_v13 }
  0xb9   : > { %v327_v32 = vmul.f32 %v323_v2, %v323_v2 }
  0xba   : > { %v310_v18 = vpop.permute.xlu1 %309  ;;  %v422_v19 = vpop.permute.xlu0 %421 }
  0xbb   : > { %v315_v21 = vadd.f32 %v310_v18, %v302_v15  ;;  %v426_v22 = vadd.f32 %v422_v19, %v407_v16 }
  0xbd   : > { %v325_v29 = vadd.f32 %v318_v10, %v315_v21  ;;  %v437_v38 = vadd.f32 %v433_v23, %v426_v22 }
  0xbf   : > { %v329_v60 = vmul.f32 %v325_v29, %v325_v29  ;;  %v469_v37 = vadd.f32 %v465_v42, %v437_v38 }
  0xc1   : > { %v331_v47 = vadd.f32 %v329_v60, %v327_v32  ;;  %v473_v44 = vmul.f32 %v469_v37, %v469_v37 }
  0xc2   : > { %v457_v50 = vpop.permute.xlu1 %456  ;;  %v455_v57 = vpop.permute.xlu0 %454 }
  0xc3   : > { %v970_v31 = vadd.f32 1e-06, %v331_v47  ;;  %v461_v62 = vadd.f32 %v457_v50, %v448_v48  ;;  %v460_v5 = vadd.f32 %v455_v57, %v447_v0 }
  0xc5   : > { %v471_v63 = vadd.f32 %v465_v42, %v461_v62  ;;  %663 = vrsqrt.f32 %v970_v31  ;;  %vm342_vm4 = vcmp.eq.f32.partialorder %v970_v31, inf  ;;  %vm344_vm6 = vcmp.eq.f32.partialorder %v970_v31, 0.0 }
  0xc6   : > { %v345_v51 = vand.u32 2147483648, %v970_v31 }
  0xc7   : > { %v475_v58 = vmul.f32 %v471_v63, %v471_v63 }
  0xc9   : > { %v477_v4 = vadd.f32 %v475_v58, %v473_v44 }
  0xca   : > { %v463_v1 = vpop.permute.xlu1 %462  ;;  %v320_v6 = vpop.permute.xlu0 %319 }
  0xcb   : > { %v664_v7 = vpop.eup %663  ;;  %v978_v8 = vadd.f32 1e-06, %v477_v4  ;;  %v468_v9 = vadd.f32 %v463_v1, %v436_v35  ;;  %v470_v10 = vadd.f32 %v463_v1, %v460_v5  ;;  %v324_v34 = vadd.f32 %v320_v6, %v292_v3 }
  0xcc   : > { %v326_v11 = vadd.f32 %v320_v6, %v316_v56  ;;  %v336_v61 = vmul.f32 %v664_v7, %v970_v31 }
  0xcd   : > { %v472_v12 = vmul.f32 %v468_v9, %v468_v9  ;;  %v474_v13 = vmul.f32 %v470_v10, %v470_v10  ;;  %v328_v33 = vmul.f32 %v324_v34, %v324_v34  ;;  %665 = vrsqrt.f32 %v978_v8 }
  0xce   : > { %v330_v14 = vmul.f32 %v326_v11, %v326_v11  ;;  %v337_v59 = vmul.f32 %v664_v7, %v336_v61  ;;  %vm499_vm5 = vcmp.eq.f32.partialorder %v978_v8, inf  ;;  %vm501_vm7 = vcmp.eq.f32.partialorder %v978_v8, 0.0 }
  0xcf   : > { %v476_v46 = vadd.f32 %v474_v13, %v472_v12  ;;  %v502_v52 = vand.u32 2147483648, %v978_v8 }
  0xd0   : > { %v332_v15 = vadd.f32 %v330_v14, %v328_v33  ;;  %v338_v19 = vmul.f32 0.5, %v337_v59 }
  0xd1   : > { %v478_v16 = vadd.f32 1e-06, %v476_v46 }
  0xd2   : > { %v334_v17 = vadd.f32 1e-06, %v332_v15  ;;  %v339_v21 = vsub.f32 1.5, %v338_v19 }
  0xd3   : > { %v666_v18 = vpop.eup %665  ;;  %667 = vrsqrt.f32 %v478_v16  ;;  %vm487_vm8 = vcmp.eq.f32.partialorder %v478_v16, inf  ;;  %v490_v37 = vand.u32 2147483648, %v478_v16  ;;  %vm489_vm10 = vcmp.eq.f32.partialorder %v478_v16, 0.0 }
  0xd4   : > { %669 = vrsqrt.f32 %v334_v17  ;;  %v493_v20 = vmul.f32 %v666_v18, %v978_v8  ;;  %v340_v30 = vmul.f32 %v664_v7, %v339_v21  ;;  %vm354_vm9 = vcmp.eq.f32.partialorder %v334_v17, inf }
  0xd5   : > { %v357_v62 = vand.u32 2147483648, %v334_v17  ;;  %vm356_vm11 = vcmp.eq.f32.partialorder %v334_v17, 0.0 }
  0xd6   : > { %v494_v2 = vmul.f32 %v666_v18, %v493_v20  ;;  %v341_v42 = vmul.f32 %v340_v30, %v970_v31 }
  0xd8   : > { %v495_v23 = vmul.f32 0.5, %v494_v2  ;;  %v343_v27 = vsel %vm342_vm4, %v970_v31, %v341_v42 }
  0xd9   : > { %v668_v22 = vpop.eup %667  ;;  %v346_v63 = vsel %vm344_vm6, %v345_v51, %v343_v27 }
  0xda   : > { %v670_v24 = vpop.eup %669  ;;  %v481_v28 = vmul.f32 %v668_v22, %v478_v16  ;;  %v496_v26 = vsub.f32 1.5, %v495_v23 }
  0xdb   : > { %v348_v29 = vmul.f32 %v670_v24, %v334_v17 }
  0xdc   : > { %v482_v25 = vmul.f32 %v668_v22, %v481_v28  ;;  %v497_v60 = vmul.f32 %v666_v18, %v496_v26 }
  0xdd   : > { %v349_v32 = vmul.f32 %v670_v24, %v348_v29 }
  0xde   : > { %v483_v38 = vmul.f32 0.5, %v482_v25  ;;  %v498_v47 = vmul.f32 %v497_v60, %v978_v8 }
  0xdf   : > { %v350_v40 = vmul.f32 0.5, %v349_v32 }
  0xe0   : > { %v484_v43 = vsub.f32 1.5, %v483_v38  ;;  %v500_v39 = vsel %vm499_vm5, %v978_v8, %v498_v47 }
  0xe1   : > { %v351_v45 = vsub.f32 1.5, %v350_v40  ;;  %v503_v54 = vsel %vm501_vm7, %v502_v52, %v500_v39 }
  0xe2   : > { %v485_v48 = vmul.f32 %v668_v22, %v484_v43 }
  0xe3   : > { %v352_v49 = vmul.f32 %v670_v24, %v351_v45 }
  0xe4   : > { %v486_v50 = vmul.f32 %v485_v48, %v478_v16 }
  0xe5   : > { %v353_v57 = vmul.f32 %v352_v49, %v334_v17 }
  0xe6   : > { %v488_v55 = vsel %vm487_vm8, %v478_v16, %v486_v50 }
  0xe7   : > { %v355_v53 = vsel %vm354_vm9, %v334_v17, %v353_v57  ;;  %v491_v41 = vsel %vm489_vm10, %v490_v37, %v488_v55 }
  0xe8   : > { %v358_v36 = vsel %vm356_vm11, %v357_v62, %v355_v53  ;;  %v504_v44 = vsub.f32 %v346_v63, %v491_v41 }
  0xe9   : > { %v505_v58 = vsub.f32 %v358_v36, %v503_v54 }
  0xea   : > { %v506_v0 = vand.u32 2147483647, %v504_v44 }
  0xeb   : > { %v507_v35 = vand.u32 2147483647, %v505_v58 }
  0xec   : > { %v509_v3 = vsel %vm508_vm12, %v506_v0, 0.0 }
  0xed   : > { %v512_v4 = vsel %vm508_vm12, %v507_v35, 0.0  ;;  %510 = vadd.xlane.f32.xlu0 %v509_v3 }
  0xee   : > { %513 = vadd.xlane.f32.xlu1 %v512_v4 }
 0x160   : > { %v511_v5 = vpop.xlane.xlu0 %510 }
 0x161   : > { %v514_v56 = vpop.xlane.xlu1 %513 }
 0x162   : > { %v515_v31 = vadd.f32 %v514_v56, %v511_v5 }
 0x164   : > { %v516_v1 = vrot.slane %v515_v31, 4 }
 0x166   : > { %v517_v6 = vadd.f32 %v516_v1, %v515_v31 }
 0x168   : > { %v518_v7 = vrot.slane %v517_v6, 2 }
 0x16a   : > { %v519_v8 = vadd.f32 %v518_v7, %v517_v6 }
 0x16c   : > { %v520_v9 = vrot.slane %v519_v8, 1 }
 0x16e   : > { %v521_v10 = vadd.f32 %v520_v9, %v519_v8 }
 0x170   : > { %522 = vst [vmem:[%s151_s14] sm:$0xff] %v521_v10 }
 0x171   : > { %698 = shalt.err (!%p695_p3)
}
 0x172   : > { %622 = dma.vmem_to_hbm [thread:$0]  (%p790_p5), %s537_s16, 128, %s539_s17, %s524_s21  }
 0x173 PF: > { %p628_p4 = scmp.ge.s32.totalorder %s733_s12, 2  ;;  %s550_s28 = sand.u32 1, %s721_s9  }
 0x174   : > { %s551_s29 = scalar_lea.sflag [#allocation3], %s550_s28 }
 0x175   : > { %p625_p7 = pnand %p628_p4, %p794_p6 }
 0x177   : > { %p626_p8 = pneg %p625_p7 }
 0x179   : > { %716 = dma.done.wait (%p626_p8), %s551_s29, 128  }
 0x17a   : > { %718 = vsyncadd (%p626_p8), %s551_s29, 4294967168  ;;  %p12_p9 = scmp.ge.s32.totalorder %s777_s15, 4   ;;  %s1034_s9 = smov %s725_s10 }
 0x17b   : > { %s1035_s10 = smov %s729_s11  ;;  %s1036_s11 = smov %s788_s18 }
 0x17c   : > { %s1037_s12 = smov %s777_s15  ;;  %14 = sbr.rel (!%p12_p9) target bundleno = 3 (0x3), region = 66 }
 0x181   :  { %557 = vsyncpa [#allocation3], 1 }
 0x182   :  { %559 = vsyncpa [#allocation3 + $0x1], 1 }

</bundles_post_ra>
